<compile_context>
chip_gen: v7x
topology: tpu7x:2x2x1
jax: 0.10.0
libtpu: 0.0.40
codegen_flags: <defaults>
</compile_context>

<pallas_src>
import jax
import jax.numpy as jnp
from jax.experimental import pallas as pl
from jax.experimental.pallas import tpu as pltpu


def _round_up(n, m):
    return ((n + m - 1) // m) * m


def _mlp_kernel(x_ref, w1_ref, b1_ref, w2_ref, b2_ref, w3_ref, b3_ref, o_ref):
    # Layer 1: [TB, D] @ [D, 64] on the MXU with f32 accumulation; bias/ReLU in f32.
    x = x_ref[...]
    h1 = jnp.dot(x, w1_ref[...], preferred_element_type=jnp.float32) + b1_ref[...]
    h1 = jnp.maximum(h1, 0.0)
    # Dropout(0.2): identity at inference time.
    # TODO(synk): training-mode dropout would need pltpu.prng_seed/prng_random_bits.
    # Layer 2: cast the activation to the weight dtype so the MXU sees matched
    # (bf16) operands; accumulate in f32, elementwise stays f32.
    h2 = jnp.dot(h1.astype(w2_ref.dtype), w2_ref[...],
                 preferred_element_type=jnp.float32) + b2_ref[...]
    h2 = jnp.maximum(h2, 0.0)
    # Layer 3 (N=1): VPU multiply + lane reduction instead of a nearly-empty MXU pass.
    z = jnp.sum(h2 * w3_ref[...], axis=-1, keepdims=True) + b3_ref[...]
    o_ref[...] = jax.nn.sigmoid(z).astype(o_ref.dtype)


def questionnaire_nn_forward(x, params, *, block_b=1024, use_bf16=True):
    """x: [B, D] float32.
    params: w1 [D,64], b1 [1,64], w2 [64,32], b2 [1,32], w3 [32,1], b3 [1,1]."""
    B, D = x.shape
    H1 = params["w1"].shape[1]
    H2 = params["w2"].shape[1]

    # Batch tile: large enough to amortize the ~0.35 us per-step overhead, small
    # enough that 2 (double-buffer) * TB * D * 2B + weights stays far below the
    # 32 MiB scoped-VMEM default (64 MiB physical on v7x).
    TB = min(block_b, _round_up(B, 8))
    B_pad = _round_up(B, TB)
    if B_pad != B:
        x = jnp.pad(x, ((0, B_pad - B), (0, 0)))

    # bf16 halves HBM bytes for the dominant x stream and matches the bf16 MXU path
    # on v5e/v6e/v7x.  Biases and the N=1 weight row stay f32 (elementwise path).
    in_dtype = jnp.bfloat16 if use_bf16 else jnp.float32
    xc = x.astype(in_dtype)
    w1 = params["w1"].astype(in_dtype)
    w2 = params["w2"].astype(in_dtype)
    w3_row = params["w3"].reshape(1, H2).astype(jnp.float32)
    b1 = params["b1"].astype(jnp.float32)
    b2 = params["b2"].astype(jnp.float32)
    b3 = params["b3"].astype(jnp.float32)

    grid = (B_pad // TB,)
    const = lambda shape: pl.BlockSpec(shape, lambda i: (0, 0))  # VMEM-resident

    itemsize = jnp.dtype(in_dtype).itemsize
    flops = 2 * B_pad * (D * H1 + H1 * H2 + H2)
    bytes_accessed = (B_pad * D * itemsize                       # x stream
                      + (D * H1 + H1 * H2) * itemsize            # bf16 weights
                      + (H2 + H1 + H2 + 1) * 4                   # w3 row + biases
                      + B_pad * 4)                               # output

    out = pl.pallas_call(
        _mlp_kernel,
        out_shape=jax.ShapeDtypeStruct((B_pad, 1), jnp.float32),
        grid=grid,
        in_specs=[
            pl.BlockSpec((TB, D), lambda i: (i, 0)),   # x: streamed per batch tile
            const((D, H1)),                            # w1
            const((1, H1)),                            # b1
            const((H1, H2)),                           # w2
            const((1, H2)),                            # b2
            const((1, H2)),                            # w3 (row form for VPU path)
            const((1, 1)),                             # b3
        ],
        out_specs=pl.BlockSpec((TB, 1), lambda i: (i, 0)),
        compiler_params=pltpu.CompilerParams(
            dimension_semantics=("parallel",)),
        cost_estimate=pl.CostEstimate(
            flops=flops, transcendentals=B_pad, bytes_accessed=bytes_accessed),
    )(xc, w1, b1, w2, b2, w3_row, b3)

    return out[:B]


def init_params(key, in_features):
    """Deterministic init mirroring nn.Linear default U(-1/sqrt(fan_in), +1/sqrt(fan_in))."""
    def linear(key, fan_in, fan_out):
        kw, kb = jax.random.split(key)
        bound = 1.0 / jnp.sqrt(fan_in)
        w = jax.random.uniform(kw, (fan_in, fan_out), jnp.float32, -bound, bound)
        b = jax.random.uniform(kb, (1, fan_out), jnp.float32, -bound, bound)
        return w, b

    k1, k2, k3 = jax.random.split(key, 3)
    w1, b1 = linear(k1, in_features, 64)
    w2, b2 = linear(k2, 64, 32)
    w3, b3 = linear(k3, 32, 1)
    return {"w1": w1, "b1": b1, "w2": w2, "b2": b2, "w3": w3, "b3": b3}


def reference_forward(x, p):
    h1 = jnp.maximum(x @ p["w1"] + p["b1"], 0.0)
    h2 = jnp.maximum(h1 @ p["w2"] + p["b2"], 0.0)
    return jax.nn.sigmoid(h2 @ p["w3"] + p["b3"])


if __name__ == "__main__":
    key = jax.random.PRNGKey(0)
    k_x, k_p, k_x2 = jax.random.split(key, 3)

    # Small shapes consistent with the module: 16 questionnaire features
    # (X_train.shape[1]), input assumed already StandardScaler-standardized.
    B, D = 8, 16
    x = jax.random.normal(k_x, (B, D), dtype=jnp.float32)
    params = init_params(k_p, D)
    ref = reference_forward(x, params)

    # 1) f32 path: bitwise-close check against the pure-JAX reference.
    out_f32 = jax.block_until_ready(
        questionnaire_nn_forward(x, params, use_bf16=False))
    assert out_f32.shape == (B, 1)
    assert jnp.allclose(out_f32, ref, atol=1e-5, rtol=1e-5)

    # 2) Default bf16 fast path (looser tolerance for bf16 operands).
    out_bf16 = jax.block_until_ready(questionnaire_nn_forward(x, params))
    assert out_bf16.shape == (B, 1)
    assert jnp.allclose(out_bf16, ref, atol=2e-2, rtol=2e-2)

    # 3) Multi-tile grid + batch padding path (grid=(3,) with TB=128, B_pad=384).
    B2 = 300
    x2 = jax.random.normal(k_x2, (B2, D), dtype=jnp.float32)
    out2 = jax.block_until_ready(
        questionnaire_nn_forward(x2, params, block_b=128))
    ref2 = reference_forward(x2, params)
    assert out2.shape == (B2, 1)
    assert jnp.allclose(out2, ref2, atol=2e-2, rtol=2e-2)

    print("KERNEL_OK")
</pallas_src>

<mosaic_0001>
module attributes {stable_mosaic.version = 11 : i64} {
  func.func @_mlp_kernel(%arg0: i32, %arg1: memref<8x16xf32, #tpu.memory_space<vmem>>, %arg2: memref<16x64xf32, #tpu.memory_space<vmem>>, %arg3: memref<1x64xf32, #tpu.memory_space<vmem>>, %arg4: memref<64x32xf32, #tpu.memory_space<vmem>>, %arg5: memref<1x32xf32, #tpu.memory_space<vmem>>, %arg6: memref<1x32xf32, #tpu.memory_space<vmem>>, %arg7: memref<1x1xf32, #tpu.memory_space<vmem>>, %arg8: memref<8x1xf32, #tpu.memory_space<vmem>>) attributes {dimension_semantics = [#tpu.dimension_semantics<parallel>], iteration_bounds = array<i64: 1>, scalar_prefetch = 0 : i64, scratch_operands = 0 : i64, tpu.core_type = #tpu.core_type<tc>, window_params = [{transform_indices = @transform_0, window_bounds = array<i64: 8, 16>}, {pipeline_mode = #tpu.pipeline_mode<synchronous>, transform_indices = @transform_1, window_bounds = array<i64: 16, 64>}, {pipeline_mode = #tpu.pipeline_mode<synchronous>, transform_indices = @transform_2, window_bounds = array<i64: 1, 64>}, {pipeline_mode = #tpu.pipeline_mode<synchronous>, transform_indices = @transform_3, window_bounds = array<i64: 64, 32>}, {pipeline_mode = #tpu.pipeline_mode<synchronous>, transform_indices = @transform_4, window_bounds = array<i64: 1, 32>}, {pipeline_mode = #tpu.pipeline_mode<synchronous>, transform_indices = @transform_5, window_bounds = array<i64: 1, 32>}, {pipeline_mode = #tpu.pipeline_mode<synchronous>, transform_indices = @transform_6, window_bounds = array<i64: 1, 1>}, {transform_indices = @transform_7, window_bounds = array<i64: 8, 1>}]} {
    %c0 = arith.constant 0 : index
    %c0_0 = arith.constant 0 : index
    %0 = vector.load %arg1[%c0, %c0_0] : memref<8x16xf32, #tpu.memory_space<vmem>>, vector<8x16xf32>
    %c0_1 = arith.constant 0 : index
    %c0_2 = arith.constant 0 : index
    %1 = vector.load %arg2[%c0_1, %c0_2] : memref<16x64xf32, #tpu.memory_space<vmem>>, vector<16x64xf32>
    %cst = arith.constant dense<0.000000e+00> : vector<8x64xf32>
    %2 = tpu.matmul %0, %1, %cst {dimension_numbers = #tpu.dot_dimension_numbers<[1], [0], [0], [1], [0, 0, 1, 1], [], []>} : vector<8x16xf32>, vector<16x64xf32>, vector<8x64xf32> -> vector<8x64xf32>
    %c0_3 = arith.constant 0 : index
    %c0_4 = arith.constant 0 : index
    %3 = vector.load %arg3[%c0_3, %c0_4] : memref<1x64xf32, #tpu.memory_space<vmem>>, vector<1x64xf32>
    %4 = vector.broadcast %3 : vector<1x64xf32> to vector<8x64xf32>
    %5 = arith.addf %2, %4 : vector<8x64xf32>
    %cst_5 = arith.constant 0.000000e+00 : f32
    %6 = vector.broadcast %cst_5 : f32 to vector<8x64xf32>
    %7 = arith.maximumf %5, %6 : vector<8x64xf32>
    %c0_6 = arith.constant 0 : index
    %c0_7 = arith.constant 0 : index
    %8 = vector.load %arg4[%c0_6, %c0_7] : memref<64x32xf32, #tpu.memory_space<vmem>>, vector<64x32xf32>
    %cst_8 = arith.constant dense<0.000000e+00> : vector<8x32xf32>
    %9 = tpu.matmul %7, %8, %cst_8 {dimension_numbers = #tpu.dot_dimension_numbers<[1], [0], [0], [1], [0, 0, 1, 1], [], []>} : vector<8x64xf32>, vector<64x32xf32>, vector<8x32xf32> -> vector<8x32xf32>
    %c0_9 = arith.constant 0 : index
    %c0_10 = arith.constant 0 : index
    %10 = vector.load %arg5[%c0_9, %c0_10] : memref<1x32xf32, #tpu.memory_space<vmem>>, vector<1x32xf32>
    %11 = vector.broadcast %10 : vector<1x32xf32> to vector<8x32xf32>
    %12 = arith.addf %9, %11 : vector<8x32xf32>
    %cst_11 = arith.constant 0.000000e+00 : f32
    %13 = vector.broadcast %cst_11 : f32 to vector<8x32xf32>
    %14 = arith.maximumf %12, %13 : vector<8x32xf32>
    %c0_12 = arith.constant 0 : index
    %c0_13 = arith.constant 0 : index
    %15 = vector.load %arg6[%c0_12, %c0_13] : memref<1x32xf32, #tpu.memory_space<vmem>>, vector<1x32xf32>
    %16 = vector.broadcast %15 : vector<1x32xf32> to vector<8x32xf32>
    %17 = arith.mulf %14, %16 : vector<8x32xf32>
    %cst_14 = arith.constant dense<0.000000e+00> : vector<8xf32>
    %18 = vector.multi_reduction <add>, %17, %cst_14 [1] : vector<8x32xf32> to vector<8xf32>
    %19 = vector.shape_cast %18 : vector<8xf32> to vector<8x1xf32>
    %c0_15 = arith.constant 0 : index
    %c0_16 = arith.constant 0 : index
    %20 = vector.load %arg7[%c0_15, %c0_16] : memref<1x1xf32, #tpu.memory_space<vmem>>, vector<1x1xf32>
    %21 = vector.broadcast %20 : vector<1x1xf32> to vector<8x1xf32>
    %22 = arith.addf %19, %21 : vector<8x1xf32>
    %23 = arith.negf %22 : vector<8x1xf32>
    %24 = math.exp %23 : vector<8x1xf32>
    %cst_17 = arith.constant 1.000000e+00 : f32
    %25 = vector.broadcast %cst_17 : f32 to vector<8x1xf32>
    %26 = arith.addf %25, %24 : vector<8x1xf32>
    %27 = arith.divf %25, %26 : vector<8x1xf32>
    %c0_18 = arith.constant 0 : index
    %c0_19 = arith.constant 0 : index
    %28 = vector.load %arg8[%c0_18, %c0_19] : memref<8x1xf32, #tpu.memory_space<vmem>>, vector<8x1xf32>
    tpu.vector_store %arg8[%c0_18, %c0_19], %27 {strides = array<i32>} : memref<8x1xf32, #tpu.memory_space<vmem>>, vector<8x1xf32>,
    return
  }
  func.func @transform_0(%arg0: i32) -> (i32, i32) {
    %c0_i32 = arith.constant 0 : i32
    %c0_i32_0 = arith.constant 0 : i32
    return %arg0, %c0_i32 : i32, i32
  }
  func.func @transform_1(%arg0: i32) -> (i32, i32) {
    %c0_i32 = arith.constant 0 : i32
    %c0_i32_0 = arith.constant 0 : i32
    %c0_i32_1 = arith.constant 0 : i32
    return %c0_i32, %c0_i32_0 : i32, i32
  }
  func.func @transform_2(%arg0: i32) -> (i32, i32) {
    %c0_i32 = arith.constant 0 : i32
    %c0_i32_0 = arith.constant 0 : i32
    %c0_i32_1 = arith.constant 0 : i32
    return %c0_i32, %c0_i32_0 : i32, i32
  }
  func.func @transform_3(%arg0: i32) -> (i32, i32) {
    %c0_i32 = arith.constant 0 : i32
    %c0_i32_0 = arith.constant 0 : i32
    %c0_i32_1 = arith.constant 0 : i32
    return %c0_i32, %c0_i32_0 : i32, i32
  }
  func.func @transform_4(%arg0: i32) -> (i32, i32) {
    %c0_i32 = arith.constant 0 : i32
    %c0_i32_0 = arith.constant 0 : i32
    %c0_i32_1 = arith.constant 0 : i32
    return %c0_i32, %c0_i32_0 : i32, i32
  }
  func.func @transform_5(%arg0: i32) -> (i32, i32) {
    %c0_i32 = arith.constant 0 : i32
    %c0_i32_0 = arith.constant 0 : i32
    %c0_i32_1 = arith.constant 0 : i32
    return %c0_i32, %c0_i32_0 : i32, i32
  }
  func.func @transform_6(%arg0: i32) -> (i32, i32) {
    %c0_i32 = arith.constant 0 : i32
    %c0_i32_0 = arith.constant 0 : i32
    %c0_i32_1 = arith.constant 0 : i32
    return %c0_i32, %c0_i32_0 : i32, i32
  }
  func.func @transform_7(%arg0: i32) -> (i32, i32) {
    %c0_i32 = arith.constant 0 : i32
    %c0_i32_0 = arith.constant 0 : i32
    return %arg0, %c0_i32 : i32, i32
  }
}

</mosaic_0001>

<bundles_post_ra>
// kernel: tpu_custom_call.1
= control target key start
LH: loop header
LB: loop body
LE: loop exit
PB: predicated region body
PF: predicated region fallthrough
CT: control target
= control target key end

     0   :  { %v302_v0 = vmov 0.0|0.0   ;;  %vm303_vm0 = vmmov 0   ;;  %v304_v3 = vmov 0.0   ;;  %vm38_vm1 = vcmask 130048   ;;  %s393_s1 = inlined_call_operand.vmem [shape: f32[16,64], index: 1, kind: input, shape index: {}]   ;;  %s394_s3 = inlined_call_operand.vmem [shape: f32[64,32], index: 3, kind: input, shape index: {}]   ;;  %s395_s0 = inlined_call_operand.vmem [shape: f32[8,16], index: 0, kind: input, shape index: {}]   ;;  %s396_s2 = inlined_call_operand.vmem [shape: f32[1,64], index: 2, kind: input, shape index: {}]   ;;  %s397_s6 = inlined_call_operand.<no memory space> [shape: f32[1,1], index: 6, kind: input, shape index: {}]   ;;  %s398_s4 = inlined_call_operand.vmem [shape: f32[1,32], index: 4, kind: input, shape index: {}]   ;;  %s399_s5 = inlined_call_operand.vmem [shape: f32[1,32], index: 5, kind: input, shape index: {}]   ;;  %s400_s7 = inlined_call_operand.vmem [shape: f32[8,1], index: 7, kind: output, shape index: {}]  }
   0x1   :  { %280 = vmatprep.subr.bf16.mxu0 %v302_v0  ;;  %v29_v1 = vld [vmem:[%s393_s1] sm:$0xff]  ;;  %v30_v2 = vld [vmem:[%s393_s1 + $0x8] sm:$0xff]  ;;  %258 = vmatprep.mubr.msk.f32.mxu0 %vm303_vm0, %v304_v3  ;;  %v115_v7 = vld [vmem:[%s394_s3 + $0x10] sm:$0xff]  ;;  %vm128_vm2 = vcmask 523264   ;;  %v12_v23 = vstv %s397_s6  ;;  %vm211_vm3 = vcmask 261120   ;;  %vm229_vm4 = vcmask 7168  }
   0x2   :  { %v281_v4 = vpack.c.bf16 %v30_v2, %v29_v1  ;;  %283 = vmatprep.subr.bf16.mxu1 %v302_v0  ;;  %v113_v5 = vld [vmem:[%s394_s3] sm:$0xff]  ;;  %v114_v6 = vld [vmem:[%s394_s3 + $0x8] sm:$0xff]  ;;  %277 = vmatprep.mubr.msk.f32.mxu1 %vm303_vm0, %v304_v3  ;;  %v116_v9 = vld [vmem:[%s394_s3 + $0x18] sm:$0xff]  ;;  %13 = vst [vmem:[#allocation2] sm:$0x1] %v12_v23 }
   0x3   :  { %v284_v8 = vpack.c.bf16 %v114_v6, %v113_v5  ;;  %v28_v10 = vld [vmem:[%s395_s0] sm:$0xff]  ;;  %v287_v11 = vpack.c.bf16 %v116_v9, %v115_v7  ;;  %v118_v13 = vld [vmem:[%s394_s3 + $0x28] sm:$0xff]  ;;  %v119_v15 = vld [vmem:[%s394_s3 + $0x30] sm:$0xff] }
   0x4   :  { %282 = vmatpush3.bf16.msra.mxu0 %v281_v4  ;;  %v117_v12 = vld [vmem:[%s394_s3 + $0x20] sm:$0xff]  ;;  %v120_v16 = vld [vmem:[%s394_s3 + $0x38] sm:$0xff] }
   0x5   :  { %285 = vmatpush3.bf16.msra.mxu1 %v284_v8  ;;  %v290_v14 = vpack.c.bf16 %v118_v13, %v117_v12  ;;  %v293_v17 = vpack.c.bf16 %v120_v16, %v119_v15  ;;  %v235_v18 = vld [vmem:[%s396_s2] ss:$0 sm:$0xff] }
   0x6   :  { %286 = vmatprep.subr.bf16.mxu1 %v302_v0  ;;  %v237_v24 = vld [vmem:[%s398_s4] ss:$0 sm:$0xff] }
   0x7   :  { %259 = vmatmul.mubr.msk.f32.vlgmr.msra.gmra.mrb[0].mxu0 %vm38_vm1, %v28_v10  ;;  %v239_v28 = vld [vmem:[%s399_s5] ss:$0 sm:$0xff] }
   0x9   :  { %288 = vmatpush3.bf16.msra.mxu1 %v287_v11  ;;  %v240_v32 = vld [vmem:[#allocation2] ss:$0 sm:$0xff] }
   0xa   :  { %289 = vmatprep.subr.bf16.mxu1 %v302_v0 }
   0xd   :  { %291 = vmatpush3.bf16.msra.mxu1 %v290_v14 }
   0xe   :  { %292 = vmatprep.subr.bf16.mxu1 %v302_v0 }
  0x11   :  { %294 = vmatpush3.bf16.msra.mxu1 %v293_v17 }
  0xda   :  { %v108_v19 = vpop.f32.mrb[0].mxu0 }
  0xdb   :  { %v109_v20 = vadd.f32 %v235_v18, %v108_v19  ;;  %v260_v21 = vpop.f32.mrb[1].mxu0 }
  0xdd   :  { %v112_v22 = vmax.f32 %v109_v20, 0.0 }
  0xdf   :  { %278 = vmatmul.mubr.msk.f32.vlgmr.msra.gmra.mrb[0].mxu1 %vm128_vm2, %v112_v22 }
 0x1b2   :  { %v198_v25 = vpop.f32.mrb[0].mxu1 }
 0x1b3   :  { %v199_v26 = vadd.f32 %v237_v24, %v198_v25  ;;  %v279_v27 = vpop.f32.mrb[1].mxu1 }
 0x1b5   :  { %v202_v29 = vmax.f32 %v199_v26, 0.0 }
 0x1b7   :  { %v210_v30 = vmul.f32 %v239_v28, %v202_v29 }
 0x1b9   :  { %v212_v31 = vsel %vm211_vm3, %v210_v30, 0.0 }
 0x1ba   :  { %213 = vadd.xlane.f32.xlu0 %v212_v31 }
 0x247   :  { %v214_v33 = vpop.xlane.xlu0 %213 }
 0x248   :  { %v222_v34 = vadd.f32 %v240_v32, %v214_v33 }
 0x24a   :  { %v241_v35 = vmul.f32 -1.442695, %v222_v34 }
 0x24c   :  { %298 = vpow2.f32 %v241_v35 }
 0x256   :  { %v299_v36 = vpop.eup %298 }
 0x257   :  { %v226_v37 = vadd.f32 1.0, %v299_v36 }
 0x259   :  { %300 = vrcp.f32 %v226_v37 }
 0x263   :  { %v301_v38 = vpop.eup %300 }
 0x264   :  { %230 = vst.msk [vmem:[%s400_s7] sm:$0xff] %vm229_vm4, %v301_v38 }

</bundles_post_ra>
